<compile_context>
chip_gen: v7x
topology: tpu7x:2x2x1
jax: 0.10.0
libtpu: 0.0.40
codegen_flags: <defaults>
</compile_context>

<pallas_src>
import functools

import jax
import jax.numpy as jnp
from jax.experimental import pallas as pl
from jax.experimental.pallas import tpu as pltpu

LANE = 128  # TPU vreg lane width


def churn_mlp_kernel(x_ref, w1_ref, b1_ref, w2_ref, b2_ref, w3_ref, b3_ref, o_ref):
    """Fused transposed 3-layer MLP on one batch tile.

    Shapes (TB = batch tile on the lane axis):
      x_ref : (F, TB)      w1_ref: (H1, F)   b1_ref: (H1, 1)
      w2_ref: (H2, H1)     b2_ref: (H2, 1)
      w3_ref: (H2, 1)      b3_ref: (1, 1)
      o_ref : (1, TB)
    """
    # Layer 1: Linear(F, H1) + ReLU.  bf16 operands, f32 accumulate (MXU).
    x = x_ref[...].astype(jnp.bfloat16)
    w1 = w1_ref[...].astype(jnp.bfloat16)
    h1 = jnp.dot(w1, x, preferred_element_type=jnp.float32) + b1_ref[...]
    h1 = jnp.maximum(h1, 0.0)

    # Dropout(0.2): identity in eval/inference mode.

    # Layer 2: Linear(H1, H2) + ReLU.
    w2 = w2_ref[...].astype(jnp.bfloat16)
    h2 = jnp.dot(w2, h1.astype(jnp.bfloat16), preferred_element_type=jnp.float32)
    h2 = jnp.maximum(h2 + b2_ref[...], 0.0)

    # Layer 3: Linear(H2, 1) as VPU multiply + cross-sublane reduction (XLU),
    # keeping the whole layer in f32 and avoiding a near-empty (M=1) MXU push.
    out = jnp.sum(h2 * w3_ref[...], axis=0, keepdims=True) + b3_ref[...]

    o_ref[...] = out.astype(o_ref.dtype)  # lane-dense (1, TB) store


def churn_predictor_forward(x, params, *, tile_b: int = 512):
    """Run the fused MLP kernel.

    x: (B, F) float32, PyTorch Linear input layout.
    params: (w1, b1, w2, b2, w3, b3) with weights in PyTorch-native (out, in)
            orientation, biases as column vectors, and w3 stored as (H2, 1).
    Returns (B, 1) float32.
    """
    w1, b1, w2, b2, w3, b3 = params
    B, F = x.shape
    H1 = w1.shape[0]
    H2 = w2.shape[0]

    # Batch tile: multiple of 128 lanes; pad B up to a whole number of tiles.
    tb = max(LANE, (tile_b // LANE) * LANE)
    b_lane = pl.cdiv(B, LANE) * LANE
    TB = min(tb, b_lane)
    B_pad = pl.cdiv(b_lane, TB) * TB
    num_tiles = B_pad // TB

    # Layout plumbing in the wrapper: batch onto the lane axis, zero-pad tail.
    x_t = jnp.zeros((F, B_pad), jnp.float32).at[:, :B].set(x.T.astype(jnp.float32))

    weight_bytes = 4 * (F * H1 + H1 + H1 * H2 + H2 + H2 + 1)
    cost = pl.CostEstimate(
        flops=2 * B_pad * (F * H1 + H1 * H2 + H2),
        transcendentals=0,
        bytes_accessed=4 * B_pad * (F + 1) + weight_bytes,
    )

    resident = lambda shape: pl.BlockSpec(shape, lambda i: (0, 0))  # stays in VMEM

    out_t = pl.pallas_call(
        churn_mlp_kernel,
        out_shape=jax.ShapeDtypeStruct((1, B_pad), jnp.float32),
        grid=(num_tiles,),
        in_specs=[
            pl.BlockSpec((F, TB), lambda i: (0, i)),  # streamed batch tiles
            resident(w1.shape), resident(b1.shape),
            resident(w2.shape), resident(b2.shape),
            resident(w3.shape), resident(b3.shape),
        ],
        out_specs=pl.BlockSpec((1, TB), lambda i: (0, i)),  # lane-dense output
        compiler_params=pltpu.CompilerParams(
            dimension_semantics=("parallel",),  # megacore sharding on v7x
        ),
        cost_estimate=cost,
    )(x_t, w1, b1, w2, b2, w3, b3)

    return out_t[:, :B].T  # back to PyTorch-style (B, 1)


def init_params(key, input_size: int = 10, hidden_size: int = 32):
    """nn.Linear-default-like init, stored in the kernel's layout."""
    k = jax.random.split(key, 6)
    h2 = hidden_size // 2

    def lin(kw, kb, fan_in, fan_out):
        bound = 1.0 / jnp.sqrt(jnp.float32(fan_in))
        w = jax.random.uniform(kw, (fan_out, fan_in), jnp.float32, -bound, bound)
        b = jax.random.uniform(kb, (fan_out, 1), jnp.float32, -bound, bound)
        return w, b

    w1, b1 = lin(k[0], k[1], input_size, hidden_size)     # (H1, F), (H1, 1)
    w2, b2 = lin(k[2], k[3], hidden_size, h2)              # (H2, H1), (H2, 1)
    w3t, b3 = lin(k[4], k[5], h2, 1)                       # (1, H2), (1, 1)
    w3 = w3t.T                                             # stored as (H2, 1)
    return (w1, b1, w2, b2, w3, b3)


def reference_forward(x, params, matmul_dtype=jnp.float32):
    """Pure-JAX reference; matmul_dtype=bf16 mirrors the kernel's MXU precision."""
    w1, b1, w2, b2, w3, b3 = params
    xt = x.T
    h1 = jnp.dot(w1.astype(matmul_dtype), xt.astype(matmul_dtype),
                 preferred_element_type=jnp.float32) + b1
    h1 = jnp.maximum(h1, 0.0)
    h2 = jnp.dot(w2.astype(matmul_dtype), h1.astype(matmul_dtype),
                 preferred_element_type=jnp.float32) + b2
    h2 = jnp.maximum(h2, 0.0)
    out = jnp.sum(h2 * w3, axis=0, keepdims=True) + b3
    return out.T


if __name__ == "__main__":
    key = jax.random.PRNGKey(0)
    kx, kp, kx2 = jax.random.split(key, 3)

    batch = 8
    input_size = 10
    hidden_size = 32

    x = jax.random.normal(kx, (batch, input_size), dtype=jnp.float32)
    params = init_params(kp, input_size=input_size, hidden_size=hidden_size)

    # Small-batch run (single grid step, padded to one 128-lane tile).
    out = jax.block_until_ready(churn_predictor_forward(x, params))
    assert out.shape == (batch, 1)

    # Tight check vs a reference that matches the kernel's bf16-MXU precision.
    ref_match = reference_forward(x, params, matmul_dtype=jnp.bfloat16)
    assert jnp.allclose(out, ref_match, atol=1e-3, rtol=1e-3)
    # Looser check vs the pure-f32 PyTorch-equivalent math (bf16 operand error).
    ref_f32 = reference_forward(x, params, matmul_dtype=jnp.float32)
    assert jnp.allclose(out, ref_f32, atol=1e-1, rtol=5e-2)

    # Multi-tile run to exercise the batch grid + padding path (grid = 3).
    x_big = jax.random.normal(kx2, (300, input_size), dtype=jnp.float32)
    out_big = jax.block_until_ready(
        churn_predictor_forward(x_big, params, tile_b=128)
    )
    ref_big = reference_forward(x_big, params, matmul_dtype=jnp.bfloat16)
    assert out_big.shape == (300, 1)
    assert jnp.allclose(out_big, ref_big, atol=1e-3, rtol=1e-3)

    print("KERNEL_OK")
</pallas_src>

<mosaic_0001>
module attributes {stable_mosaic.version = 11 : i64} {
  func.func @churn_mlp_kernel(%arg0: i32, %arg1: memref<10x128xf32, #tpu.memory_space<vmem>>, %arg2: memref<32x10xf32, #tpu.memory_space<vmem>>, %arg3: memref<32x1xf32, #tpu.memory_space<vmem>>, %arg4: memref<16x32xf32, #tpu.memory_space<vmem>>, %arg5: memref<16x1xf32, #tpu.memory_space<vmem>>, %arg6: memref<16x1xf32, #tpu.memory_space<vmem>>, %arg7: memref<1x1xf32, #tpu.memory_space<vmem>>, %arg8: memref<1x128xf32, #tpu.memory_space<vmem>>) attributes {dimension_semantics = [#tpu.dimension_semantics<parallel>], iteration_bounds = array<i64: 1>, scalar_prefetch = 0 : i64, scratch_operands = 0 : i64, tpu.core_type = #tpu.core_type<tc>, window_params = [{transform_indices = @transform_0, window_bounds = array<i64: 10, 128>}, {pipeline_mode = #tpu.pipeline_mode<synchronous>, transform_indices = @transform_1, window_bounds = array<i64: 32, 10>}, {pipeline_mode = #tpu.pipeline_mode<synchronous>, transform_indices = @transform_2, window_bounds = array<i64: 32, 1>}, {pipeline_mode = #tpu.pipeline_mode<synchronous>, transform_indices = @transform_3, window_bounds = array<i64: 16, 32>}, {pipeline_mode = #tpu.pipeline_mode<synchronous>, transform_indices = @transform_4, window_bounds = array<i64: 16, 1>}, {pipeline_mode = #tpu.pipeline_mode<synchronous>, transform_indices = @transform_5, window_bounds = array<i64: 16, 1>}, {pipeline_mode = #tpu.pipeline_mode<synchronous>, transform_indices = @transform_6, window_bounds = array<i64: 1, 1>}, {transform_indices = @transform_7, window_bounds = array<i64: 1, 128>}]} {
    %c0 = arith.constant 0 : index
    %c0_0 = arith.constant 0 : index
    %0 = vector.load %arg1[%c0, %c0_0] : memref<10x128xf32, #tpu.memory_space<vmem>>, vector<10x128xf32>
    %1 = arith.truncf %0 : vector<10x128xf32> to vector<10x128xbf16>
    %c0_1 = arith.constant 0 : index
    %c0_2 = arith.constant 0 : index
    %2 = vector.load %arg2[%c0_1, %c0_2] : memref<32x10xf32, #tpu.memory_space<vmem>>, vector<32x10xf32>
    %3 = arith.truncf %2 : vector<32x10xf32> to vector<32x10xbf16>
    %cst = arith.constant dense<0.000000e+00> : vector<32x128xf32>
    %4 = tpu.matmul %3, %1, %cst {dimension_numbers = #tpu.dot_dimension_numbers<[1], [0], [0], [1], [0, 0, 1, 1], [], []>} : vector<32x10xbf16>, vector<10x128xbf16>, vector<32x128xf32> -> vector<32x128xf32>
    %c0_3 = arith.constant 0 : index
    %c0_4 = arith.constant 0 : index
    %5 = vector.load %arg3[%c0_3, %c0_4] : memref<32x1xf32, #tpu.memory_space<vmem>>, vector<32x1xf32>
    %6 = vector.broadcast %5 : vector<32x1xf32> to vector<32x128xf32>
    %7 = arith.addf %4, %6 : vector<32x128xf32>
    %cst_5 = arith.constant 0.000000e+00 : f32
    %8 = vector.broadcast %cst_5 : f32 to vector<32x128xf32>
    %9 = arith.maximumf %7, %8 : vector<32x128xf32>
    %c0_6 = arith.constant 0 : index
    %c0_7 = arith.constant 0 : index
    %10 = vector.load %arg4[%c0_6, %c0_7] : memref<16x32xf32, #tpu.memory_space<vmem>>, vector<16x32xf32>
    %11 = arith.truncf %10 : vector<16x32xf32> to vector<16x32xbf16>
    %12 = arith.truncf %9 : vector<32x128xf32> to vector<32x128xbf16>
    %cst_8 = arith.constant dense<0.000000e+00> : vector<16x128xf32>
    %13 = tpu.matmul %11, %12, %cst_8 {dimension_numbers = #tpu.dot_dimension_numbers<[1], [0], [0], [1], [0, 0, 1, 1], [], []>} : vector<16x32xbf16>, vector<32x128xbf16>, vector<16x128xf32> -> vector<16x128xf32>
    %c0_9 = arith.constant 0 : index
    %c0_10 = arith.constant 0 : index
    %14 = vector.load %arg5[%c0_9, %c0_10] : memref<16x1xf32, #tpu.memory_space<vmem>>, vector<16x1xf32>
    %15 = vector.broadcast %14 : vector<16x1xf32> to vector<16x128xf32>
    %16 = arith.addf %13, %15 : vector<16x128xf32>
    %cst_11 = arith.constant 0.000000e+00 : f32
    %17 = vector.broadcast %cst_11 : f32 to vector<16x128xf32>
    %18 = arith.maximumf %16, %17 : vector<16x128xf32>
    %c0_12 = arith.constant 0 : index
    %c0_13 = arith.constant 0 : index
    %19 = vector.load %arg6[%c0_12, %c0_13] : memref<16x1xf32, #tpu.memory_space<vmem>>, vector<16x1xf32>
    %20 = vector.broadcast %19 : vector<16x1xf32> to vector<16x128xf32>
    %21 = arith.mulf %18, %20 : vector<16x128xf32>
    %cst_14 = arith.constant dense<0.000000e+00> : vector<128xf32>
    %22 = vector.multi_reduction <add>, %21, %cst_14 [0] : vector<16x128xf32> to vector<128xf32>
    %23 = vector.shape_cast %22 : vector<128xf32> to vector<1x128xf32>
    %c0_15 = arith.constant 0 : index
    %c0_16 = arith.constant 0 : index
    %24 = vector.load %arg7[%c0_15, %c0_16] : memref<1x1xf32, #tpu.memory_space<vmem>>, vector<1x1xf32>
    %25 = vector.broadcast %24 : vector<1x1xf32> to vector<1x128xf32>
    %26 = arith.addf %23, %25 : vector<1x128xf32>
    %c0_17 = arith.constant 0 : index
    %c0_18 = arith.constant 0 : index
    %27 = vector.load %arg8[%c0_17, %c0_18] : memref<1x128xf32, #tpu.memory_space<vmem>>, vector<1x128xf32>
    tpu.vector_store %arg8[%c0_17, %c0_18], %26 {strides = array<i32>} : memref<1x128xf32, #tpu.memory_space<vmem>>, vector<1x128xf32>,
    return
  }
  func.func @transform_0(%arg0: i32) -> (i32, i32) {
    %c0_i32 = arith.constant 0 : i32
    %c0_i32_0 = arith.constant 0 : i32
    return %c0_i32, %arg0 : i32, i32
  }
  func.func @transform_1(%arg0: i32) -> (i32, i32) {
    %c0_i32 = arith.constant 0 : i32
    %c0_i32_0 = arith.constant 0 : i32
    %c0_i32_1 = arith.constant 0 : i32
    return %c0_i32, %c0_i32_0 : i32, i32
  }
  func.func @transform_2(%arg0: i32) -> (i32, i32) {
    %c0_i32 = arith.constant 0 : i32
    %c0_i32_0 = arith.constant 0 : i32
    %c0_i32_1 = arith.constant 0 : i32
    return %c0_i32, %c0_i32_0 : i32, i32
  }
  func.func @transform_3(%arg0: i32) -> (i32, i32) {
    %c0_i32 = arith.constant 0 : i32
    %c0_i32_0 = arith.constant 0 : i32
    %c0_i32_1 = arith.constant 0 : i32
    return %c0_i32, %c0_i32_0 : i32, i32
  }
  func.func @transform_4(%arg0: i32) -> (i32, i32) {
    %c0_i32 = arith.constant 0 : i32
    %c0_i32_0 = arith.constant 0 : i32
    %c0_i32_1 = arith.constant 0 : i32
    return %c0_i32, %c0_i32_0 : i32, i32
  }
  func.func @transform_5(%arg0: i32) -> (i32, i32) {
    %c0_i32 = arith.constant 0 : i32
    %c0_i32_0 = arith.constant 0 : i32
    %c0_i32_1 = arith.constant 0 : i32
    return %c0_i32, %c0_i32_0 : i32, i32
  }
  func.func @transform_6(%arg0: i32) -> (i32, i32) {
    %c0_i32 = arith.constant 0 : i32
    %c0_i32_0 = arith.constant 0 : i32
    %c0_i32_1 = arith.constant 0 : i32
    return %c0_i32, %c0_i32_0 : i32, i32
  }
  func.func @transform_7(%arg0: i32) -> (i32, i32) {
    %c0_i32 = arith.constant 0 : i32
    %c0_i32_0 = arith.constant 0 : i32
    return %c0_i32, %arg0 : i32, i32
  }
}

</mosaic_0001>

<bundles_post_ra>
// kernel: tpu_custom_call.1
= control target key start
LH: loop header
LB: loop body
LE: loop exit
PB: predicated region body
PF: predicated region fallthrough
CT: control target
= control target key end

     0   :  { %s401_s0 = inlined_call_operand.vmem [shape: f32[10,128], index: 0, kind: input, shape index: {}]   ;;  %s402_s1 = inlined_call_operand.vmem [shape: f32[32,10], index: 1, kind: input, shape index: {}]   ;;  %s403_s2 = inlined_call_operand.vmem [shape: f32[32,1], index: 2, kind: input, shape index: {}]   ;;  %s404_s3 = inlined_call_operand.vmem [shape: f32[16,32], index: 3, kind: input, shape index: {}]   ;;  %s405_s4 = inlined_call_operand.vmem [shape: f32[16,1], index: 4, kind: input, shape index: {}]   ;;  %s406_s5 = inlined_call_operand.vmem [shape: f32[16,1], index: 5, kind: input, shape index: {}]   ;;  %s407_s6 = inlined_call_operand.<no memory space> [shape: f32[1,1], index: 6, kind: input, shape index: {}]   ;;  %s408_s7 = inlined_call_operand.hbm [shape: f32[1,128], index: 7, kind: output, shape index: {}]  }
   0x1   :  { %v12_v0 = vstv %s407_s6 }
   0x2   :  { %13 = vst [vmem:[#allocation2] sm:$0x1] %v12_v0 }
   0x3   :  { %v30_v1 = vld [vmem:[%s401_s0] sm:$0xff]  ;;  %v31_v2 = vld [vmem:[%s401_s0 + $0x8] sm:$0x3]  ;;  %vm70_vm0 = vcmask 1044480   ;;  %vm63_vm1 = vcmask 80896   ;;  %v35_v6 = vld [vmem:[%s402_s1 + $0x10] sm:$0xff] }
   0x4   :  { %v33_v3 = vld [vmem:[%s402_s1] sm:$0xff]  ;;  %v32_v4 = vpack.c.bf16 %v31_v2, %v30_v1  ;;  %v34_v5 = vld [vmem:[%s402_s1 + $0x8] sm:$0xff]  ;;  %v36_v7 = vld [vmem:[%s402_s1 + $0x18] sm:$0xff]  ;;  %v292_v9 = vmov 0  }
   0x5   :  { %v37_v8 = vpack.c.bf16 %v34_v5, %v33_v3  ;;  %266 = vset.pattern.permute.xlu0 %v292_v9  ;;  %v39_v10 = vld [vmem:[%s403_s2] sm:$0xff]  ;;  %267 = vset.pattern.permute.xlu1 %v292_v9  ;;  %v41_v11 = vld [vmem:[%s403_s2 + $0x10] sm:$0xff]  ;;  %v38_v13 = vpack.c.bf16 %v36_v7, %v35_v6  ;;  %v40_v14 = vld [vmem:[%s403_s2 + $0x8] sm:$0xff] }
   0x6   :  { %261 = vmatprep.subr.msk.bf16.mxu0 %vm70_vm0, %v32_v4  ;;  %v72_v12 = vsel %vm70_vm0, %v32_v4, 0  ;;  %45 = vperm.xlu0 %266, %v39_v10  }
   0x7   :  { %248 = vmatpush3.bf16.msra.mxu0 %v72_v12  ;;  %249 = vmatprep.mubr.msk.bf16.mxu0 %vm63_vm1, %v37_v8 }
   0x8   :  { %55 = vperm.xlu1 %267, %v41_v11  }
   0x9   :  { %14 = vsyncpa [#allocation4], 0  ;;  %v42_v15 = vld [vmem:[%s403_s2 + $0x18] sm:$0xff]  ;;  %v132_v16 = vld [vmem:[%s405_s4] sm:$0xff]  ;;  %v293_v21 = vmov 0.0   ;;  %vm294_vm2 = vmmov 0   ;;  %v218_v57 = vlaneseq }
   0xa   :  { %250 = vmatmul.mubr.msk.bf16.vlgmr.msra.gmra.mrb[0].mxu0 %vm63_vm1, %v38_v13  ;;  %50 = vperm.xlu0 %266, %v40_v14   ;;  %v133_v17 = vld [vmem:[%s405_s4 + $0x8] sm:$0xff]  ;;  %v191_v18 = vld [vmem:[%s406_s5] sm:$0xff]  ;;  %vm144_vm3 = vcmask 261120  }
   0xb   :  { %v192_v19 = vld [vmem:[%s406_s5 + $0x8] sm:$0xff]  ;;  %v212_v20 = vld [vmem:[#allocation2] sm:$0x1]  ;;  %253 = vmatprep.subr.bf16.mxu1 %v293_v21  ;;  %257 = vmatprep.mubr.msk.bf16.mxu1 %vm294_vm2, %v293_v21  ;;  %v219_v60 = vshrl.u32 %v218_v57, 7 }
   0xc   :  { %60 = vperm.xlu1 %267, %v42_v15   ;;  %v127_v40 = vld [vmem:[%s404_s3] sm:$0xff]  ;;  %v128_v41 = vld [vmem:[%s404_s3 + $0x8] sm:$0xff]  ;;  %s295_s3 = smov [#allocation3]  }
   0xd   :  { %v129_v42 = vpack.c.bf16 %v128_v41, %v127_v40  ;;  %v220_v63 = vsub.s32 0, %v219_v60  ;;  %s230_s29 = sshll.u32 %s295_s3, 4  ;;  %s231_s29 = int_to_ptr.vmem [resolvable:$true] %s230_s29 }
   0xe   :  { %136 = vperm.xlu0 %266, %v132_v16   ;;  %s268_s30 = scalar_lea.vmem %s231_s29, 16  ;;  %s272_s8 = scalar_lea.vmem %s231_s29, 32 }
   0xf   :  { %p269_p0 = scmp.ne.s32.totalorder %s231_s29, %s268_s30  ;;  %p273_p1 = scmp.lt.s32.totalorder %s231_s29, %s231_s29 }
  0x10   :  { %141 = vperm.xlu1 %267, %v133_v17   ;;  %p274_p2 = scmp.lt.s32.totalorder %s272_s8, %s268_s30 }
  0x12   :  { %195 = vperm.xlu0 %266, %v191_v18   ;;  %p275_p3 = por %p274_p2, %p273_p1 }
  0x14   :  { %200 = vperm.xlu1 %267, %v192_v19   ;;  %p276_p4 = pnand %p275_p3, %p269_p0 }
  0x16   :  { %215 = vperm.xlu0 %266, %v212_v20  }
  0x85   :  { %v46_v23 = vpop.permute.xlu0 %45 }
  0x87   :  { %v56_v22 = vpop.permute.xlu1 %55 }
  0x89   :  { %v51_v30 = vpop.permute.xlu0 %50 }
  0x8b   :  { %v61_v27 = vpop.permute.xlu1 %60 }
  0x8d   :  { %v137_v43 = vpop.permute.xlu0 %136 }
  0x8f   :  { %v142_v44 = vpop.permute.xlu1 %141 }
  0x91   :  { %v196_v53 = vpop.permute.xlu0 %195 }
  0x93   :  { %v201_v54 = vpop.permute.xlu1 %200 }
  0x95   :  { %v216_v1 = vpop.permute.xlu0 %215 }
  0x96   :  { %v221_v3 = vrot.slane %v216_v1, %v220_v63 }
  0xdd   :  { %v251_v24 = vpop.f32.mrb[0].mxu0 }
  0xde   :  { %v117_v25 = vadd.f32 %v251_v24, %v56_v22  ;;  %v108_v26 = vpop.f32.mrb[1].mxu0 }
  0xdf   :  { %v109_v28 = vadd.f32 %v108_v26, %v46_v23  ;;  %v252_v29 = vpop.f32.mrb[2].mxu0 }
  0xe0   :  { %v120_v31 = vadd.f32 %v252_v29, %v61_v27  ;;  %v111_v32 = vpop.f32.mrb[3].mxu0  ;;  %v125_v34 = vmax.f32 %v117_v25, 0.0 }
  0xe1   :  { %v112_v33 = vadd.f32 %v111_v32, %v51_v30  ;;  %v123_v36 = vmax.f32 %v109_v28, 0.0 }
  0xe2   :  { %v126_v35 = vmax.f32 %v120_v31, 0.0 }
  0xe3   :  { %v124_v37 = vmax.f32 %v112_v33, 0.0 }
  0xe4   :  { %v131_v38 = vpack.c.bf16 %v126_v35, %v125_v34 }
  0xe5   :  { %v130_v39 = vpack.c.bf16 %v124_v37, %v123_v36 }
  0xe7   :  { %254 = vmatpush3.bf16.msra.mxu1 %v130_v39 }
  0xe8   :  { %255 = vmatprep.subr.bf16.mxu1 %v293_v21 }
  0xeb   :  { %256 = vmatpush3.bf16.msra.mxu1 %v131_v38 }
  0xee   :  { %258 = vmatmul.mubr.msk.bf16.vlgmr.msra.gmra.mrb[0].mxu1 %vm144_vm3, %v129_v42 }
 0x1c1   :  { %v182_v45 = vpop.f32.mrb[0].mxu1 }
 0x1c2   :  { %v183_v46 = vadd.f32 %v182_v45, %v137_v43  ;;  %v259_v47 = vpop.f32.mrb[1].mxu1 }
 0x1c3   :  { %v185_v48 = vpop.f32.mrb[2].mxu1 }
 0x1c4   :  { %v189_v49 = vmax.f32 %v183_v46, 0.0  ;;  %v186_v50 = vadd.f32 %v185_v48, %v142_v44  ;;  %v260_v51 = vpop.f32.mrb[3].mxu1 }
 0x1c6   :  { %v190_v52 = vmax.f32 %v186_v50, 0.0  ;;  %v203_v55 = vmul.f32 %v196_v53, %v189_v49 }
 0x1c8   :  { %v204_v56 = vmul.f32 %v201_v54, %v190_v52 }
 0x1ca   :  { %v205_v58 = vadd.f32 %v204_v56, %v203_v55 }
 0x1cc   :  { %v206_v59 = vrot.slane %v205_v58, 4 }
 0x1ce   :  { %v207_v61 = vadd.f32 %v206_v59, %v205_v58 }
 0x1d0   :  { %v208_v62 = vrot.slane %v207_v61, 2 }
 0x1d2   :  { %v209_v0 = vadd.f32 %v208_v62, %v207_v61 }
 0x1d4   :  { %v210_v2 = vrot.slane %v209_v0, 1 }
 0x1d6   :  { %v211_v4 = vadd.f32 %v210_v2, %v209_v0 }
 0x1d8   :  { %v222_v5 = vadd.f32 %v221_v3, %v211_v4 }
 0x1da   :  { %223 = vst [vmem:[#allocation3] sm:$0x1] %v222_v5 }
 0x1db   :  { %279 = shalt.err (!%p276_p4)
}
 0x1dc   :  { %s280_s6 = scalar_lea.hbm %s408_s7, 16 }
 0x1dd   :  { %p281_p5 = scmp.ne.s32.totalorder %s408_s7, %s280_s6  ;;  %p284_p6 = scmp.lt.u32.totalorder %s280_s6, %s408_s7 }
 0x1df   :  { %p286_p7 = pnand %p284_p6, %p281_p5 }
 0x1e1   :  { %289 = shalt.err (!%p286_p7)
}
 0x1e2   :  { %233 = dma.vmem_to_hbm [thread:$0]  %s231_s29, 16, %s408_s7, [#allocation4]  }
 0x1e3   :  { %290 = dma.done.wait [#allocation4], 16  }
 0x1e4   :  { %291 = vsyncadd [#allocation4], 4294967280 }
 0x1e5   :  { %237 = vsyncpa [#allocation4], 1 }

</bundles_post_ra>
